<compile_context>
chip_gen: v6e
topology: v6e:2x2x1
jax: 0.10.0
libtpu: 0.0.40
codegen_flags: <defaults>
</compile_context>

<pallas_src>
import functools

import jax
import jax.numpy as jnp
from jax.experimental import pallas as pl
from jax.experimental.pallas import tpu as pltpu

EPS = 1e-5


def _round_up(n, m):
    return ((n + m - 1) // m) * m


def _bn_relu(h, gamma, beta):
    # BatchNorm1d, training semantics: batch statistics, biased variance,
    # eps=1e-5.  Affine fused into one per-feature scale (EUP rsqrt); per-element
    # work is a single mul + add (centered value `c` reused from the variance).
    # Zero-padded features have var=0 -> rsqrt(eps) is large, but gamma=0 there,
    # so scale=0 and padded lanes stay exactly 0.
    mean = jnp.mean(h, axis=0, keepdims=True)            # (1, F)
    c = h - mean
    var = jnp.mean(c * c, axis=0, keepdims=True)         # (1, F), biased
    scale = gamma * jax.lax.rsqrt(var + EPS)             # (1, F)
    return jnp.maximum(c * scale + beta, 0.0)            # ReLU(True)


def batchnet_kernel(x_ref, w_ref, vec_ref, o_ref, *,
                    in_dim, h1_pad, h2_pad, out_pad):
    # x stays f32 in HBM; cast (if any) happens on the VPU here, hidden under MXU.
    x = x_ref[...].astype(w_ref.dtype)
    vecs = vec_ref[...]                                   # (8, N) f32 slab

    # layer1: Linear (bias folded away by BN mean-subtraction) -> BN -> ReLU
    w1 = w_ref[0][:in_dim, :h1_pad]
    h = jnp.dot(x, w1, preferred_element_type=jnp.float32)
    h = _bn_relu(h, vecs[0:1, :h1_pad], vecs[1:2, :h1_pad])

    # layer2: Linear (bias folded away) -> BN -> ReLU
    w2 = w_ref[1][:h1_pad, :h2_pad]
    h = jnp.dot(h.astype(w_ref.dtype), w2, preferred_element_type=jnp.float32)
    h = _bn_relu(h, vecs[2:3, :h2_pad], vecs[3:4, :h2_pad])

    # layer3: Linear with bias, lane-dense (128-aligned) output slab
    w3 = w_ref[2][:h2_pad, :out_pad]
    out = jnp.dot(h.astype(w_ref.dtype), w3, preferred_element_type=jnp.float32)
    out = out + vecs[4:5, :out_pad]
    o_ref[...] = out.astype(o_ref.dtype)


def prepare_params(params, weight_dtype=jnp.float32):
    """One-time parameter packing (hoisted out of the per-call forward path).

    Builds:
      * a single (3, K, N) zero-padded weight slab (K, N multiples of 8 / 128),
      * an (8, N) f32 slab holding g1, be1, g2, be2, b3 (b1/b2 are intentionally
        omitted: training-mode BN mean-subtraction cancels them exactly).

    weight_dtype=jnp.bfloat16 halves weight-slab DMA bytes and uses the native
    bf16 MXU path on v5e/v6e/v7x (accumulation and BN math stay f32).  Default
    f32 keeps full accuracy at toy sizes.
    """
    in_dim, h1_dim = params["w1"].shape
    _, h2_dim = params["w2"].shape
    _, out_dim = params["w3"].shape

    h1_pad = _round_up(h1_dim, 128)
    h2_pad = _round_up(h2_dim, 128)
    out_pad = _round_up(out_dim, 128)
    K = max(_round_up(in_dim, 8), h1_pad, h2_pad)         # slab row (contraction) dim
    N = max(h1_pad, h2_pad, out_pad)                      # slab col dim

    w_slab = jnp.zeros((3, K, N), jnp.float32)
    w_slab = w_slab.at[0, :in_dim, :h1_dim].set(params["w1"])
    w_slab = w_slab.at[1, :h1_dim, :h2_dim].set(params["w2"])
    w_slab = w_slab.at[2, :h2_dim, :out_dim].set(params["w3"])
    w_slab = w_slab.astype(weight_dtype)

    # Per-feature vectors packed into one tile-aligned f32 slab (BN math stays f32).
    vecs = jnp.zeros((8, N), jnp.float32)
    vecs = vecs.at[0, :h1_dim].set(params["g1"].reshape(-1))
    vecs = vecs.at[1, :h1_dim].set(params["be1"].reshape(-1))
    vecs = vecs.at[2, :h2_dim].set(params["g2"].reshape(-1))
    vecs = vecs.at[3, :h2_dim].set(params["be2"].reshape(-1))
    vecs = vecs.at[4, :out_dim].set(params["b3"].reshape(-1))

    return dict(
        w_slab=w_slab,
        vecs=vecs,
        dims=dict(in_dim=in_dim, h1_pad=h1_pad, h2_pad=h2_pad,
                  out_pad=out_pad, out_dim=out_dim),
    )


def batchnet_forward(x, prepared, *, keep_padded_output=False):
    """x: (B, in_dim) f32.  prepared: dict from prepare_params (called once)."""
    B = x.shape[0]
    d = prepared["dims"]
    in_dim, h1_pad, h2_pad = d["in_dim"], d["h1_pad"], d["h2_pad"]
    out_pad, out_dim = d["out_pad"], d["out_dim"]
    w_slab, vecs = prepared["w_slab"], prepared["vecs"]

    kernel = functools.partial(
        batchnet_kernel,
        in_dim=in_dim, h1_pad=h1_pad, h2_pad=h2_pad, out_pad=out_pad)

    itemsize = jnp.dtype(w_slab.dtype).itemsize
    flops = (2 * B * (in_dim * h1_pad + h1_pad * h2_pad + h2_pad * out_dim)
             + 10 * B * (h1_pad + h2_pad))
    bytes_accessed = (4 * x.size + itemsize * w_slab.size
                      + 4 * (vecs.size + B * out_pad))

    vmem = pl.BlockSpec(memory_space=pltpu.MemorySpace.VMEM)
    out_padded = pl.pallas_call(
        kernel,
        out_shape=jax.ShapeDtypeStruct((B, out_pad), jnp.float32),
        in_specs=[vmem, vmem, vmem],
        out_specs=vmem,
        cost_estimate=pl.CostEstimate(
            flops=flops,
            transcendentals=h1_pad + h2_pad,   # one rsqrt per BN feature
            bytes_accessed=bytes_accessed,
        ),
    )(x, w_slab, vecs)

    if keep_padded_output:
        return out_padded                      # lane-dense (B, out_pad) slab
    return out_padded[:, :out_dim]


def init_params(key, in_dim, n_hidden_1, n_hidden_2, out_dim):
    """Deterministic synthetic init (PyTorch-style uniform bounds for Linear,
    ones/zeros for BatchNorm affine)."""
    ks = jax.random.split(key, 6)

    def linear(kw, kb, fan_in, fan_out):
        bound = 1.0 / jnp.sqrt(fan_in)
        # stored as (in, out) == PyTorch weight (out, in) transposed
        w = jax.random.uniform(kw, (fan_in, fan_out), jnp.float32, -bound, bound)
        b = jax.random.uniform(kb, (1, fan_out), jnp.float32, -bound, bound)
        return w, b

    w1, b1 = linear(ks[0], ks[1], in_dim, n_hidden_1)
    w2, b2 = linear(ks[2], ks[3], n_hidden_1, n_hidden_2)
    w3, b3 = linear(ks[4], ks[5], n_hidden_2, out_dim)

    return dict(
        w1=w1, b1=b1,
        g1=jnp.ones((1, n_hidden_1), jnp.float32), be1=jnp.zeros((1, n_hidden_1), jnp.float32),
        w2=w2, b2=b2,
        g2=jnp.ones((1, n_hidden_2), jnp.float32), be2=jnp.zeros((1, n_hidden_2), jnp.float32),
        w3=w3, b3=b3,
    )


def batchnet_ref(x, p):
    """Pure-JAX reference matching the PyTorch module's forward (training-mode
    BatchNorm1d, biases b1/b2 included — they cancel under BN)."""
    def bn_relu(h, g, b):
        m = jnp.mean(h, axis=0, keepdims=True)
        v = jnp.mean((h - m) ** 2, axis=0, keepdims=True)
        return jnp.maximum((h - m) / jnp.sqrt(v + EPS) * g + b, 0.0)

    h = bn_relu(x @ p["w1"] + p["b1"], p["g1"], p["be1"])
    h = bn_relu(h @ p["w2"] + p["b2"], p["g2"], p["be2"])
    return h @ p["w3"] + p["b3"]


if __name__ == "__main__":
    batch, in_dim, h1, h2, out_dim = 8, 32, 64, 64, 16

    key = jax.random.PRNGKey(0)
    kx, kp = jax.random.split(key)
    x = jax.random.normal(kx, (batch, in_dim), jnp.float32)
    params = init_params(kp, in_dim, h1, h2, out_dim)

    # One-time packing/padding; f32 weights so the 1e-4 reference check holds.
    prepared = prepare_params(params, weight_dtype=jnp.float32)

    out = batchnet_forward(x, prepared)
    out = jax.block_until_ready(out)

    ref = batchnet_ref(x, params)
    assert out.shape == (batch, out_dim)
    assert jnp.allclose(out, ref, atol=1e-4, rtol=1e-4), "mismatch vs reference"

    print("KERNEL_OK")
</pallas_src>

<mosaic_0001>
module attributes {stable_mosaic.version = 11 : i64} {
  func.func @batchnet_kernel(%arg0: memref<8x32xf32, #tpu.memory_space<vmem>>, %arg1: memref<3x128x128xf32, #tpu.memory_space<vmem>>, %arg2: memref<8x128xf32, #tpu.memory_space<vmem>>, %arg3: memref<8x128xf32, #tpu.memory_space<vmem>>) attributes {dimension_semantics = [], scalar_prefetch = 0 : i64, scratch_operands = 0 : i64, tpu.core_type = #tpu.core_type<tc>} {
    %c0 = arith.constant 0 : index
    %c0_0 = arith.constant 0 : index
    %0 = vector.load %arg0[%c0, %c0_0] : memref<8x32xf32, #tpu.memory_space<vmem>>, vector<8x32xf32>
    %c0_1 = arith.constant 0 : index
    %c0_2 = arith.constant 0 : index
    %1 = vector.load %arg2[%c0_1, %c0_2] : memref<8x128xf32, #tpu.memory_space<vmem>>, vector<8x128xf32>
    %c0_3 = arith.constant 0 : index
    %c0_4 = arith.constant 0 : index
    %c0_5 = arith.constant 0 : index
    %2 = vector.load %arg1[%c0_3, %c0_4, %c0_5] : memref<3x128x128xf32, #tpu.memory_space<vmem>>, vector<1x128x128xf32>
    %3 = vector.shape_cast %2 : vector<1x128x128xf32> to vector<128x128xf32>
    %4 = vector.extract_strided_slice %3 {offsets = [0, 0], sizes = [32, 128], strides = [1, 1]} : vector<128x128xf32> to vector<32x128xf32>
    %cst = arith.constant dense<0.000000e+00> : vector<8x128xf32>
    %5 = tpu.matmul %0, %4, %cst {dimension_numbers = #tpu.dot_dimension_numbers<[1], [0], [0], [1], [0, 0, 1, 1], [], []>} : vector<8x32xf32>, vector<32x128xf32>, vector<8x128xf32> -> vector<8x128xf32>
    %6 = vector.extract_strided_slice %1 {offsets = [0, 0], sizes = [1, 128], strides = [1, 1]} : vector<8x128xf32> to vector<1x128xf32>
    %7 = vector.extract_strided_slice %1 {offsets = [1, 0], sizes = [1, 128], strides = [1, 1]} : vector<8x128xf32> to vector<1x128xf32>
    %cst_6 = arith.constant dense<0.000000e+00> : vector<128xf32>
    %8 = vector.multi_reduction <add>, %5, %cst_6 [0] : vector<8x128xf32> to vector<128xf32>
    %9 = vector.shape_cast %8 : vector<128xf32> to vector<1x128xf32>
    %cst_7 = arith.constant 8.000000e+00 : f32
    %10 = vector.broadcast %cst_7 : f32 to vector<1x128xf32>
    %11 = arith.divf %9, %10 : vector<1x128xf32>
    %12 = vector.broadcast %11 : vector<1x128xf32> to vector<8x128xf32>
    %13 = arith.subf %5, %12 : vector<8x128xf32>
    %14 = arith.mulf %13, %13 : vector<8x128xf32>
    %cst_8 = arith.constant dense<0.000000e+00> : vector<128xf32>
    %15 = vector.multi_reduction <add>, %14, %cst_8 [0] : vector<8x128xf32> to vector<128xf32>
    %16 = vector.shape_cast %15 : vector<128xf32> to vector<1x128xf32>
    %cst_9 = arith.constant 8.000000e+00 : f32
    %17 = vector.broadcast %cst_9 : f32 to vector<1x128xf32>
    %18 = arith.divf %16, %17 : vector<1x128xf32>
    %cst_10 = arith.constant 9.99999974E-6 : f32
    %19 = vector.broadcast %cst_10 : f32 to vector<1x128xf32>
    %20 = arith.addf %18, %19 : vector<1x128xf32>
    %21 = math.rsqrt %20 : vector<1x128xf32>
    %22 = arith.mulf %6, %21 : vector<1x128xf32>
    %23 = vector.broadcast %22 : vector<1x128xf32> to vector<8x128xf32>
    %24 = arith.mulf %13, %23 : vector<8x128xf32>
    %25 = vector.broadcast %7 : vector<1x128xf32> to vector<8x128xf32>
    %26 = arith.addf %24, %25 : vector<8x128xf32>
    %cst_11 = arith.constant 0.000000e+00 : f32
    %27 = vector.broadcast %cst_11 : f32 to vector<8x128xf32>
    %28 = arith.maximumf %26, %27 : vector<8x128xf32>
    %c1 = arith.constant 1 : index
    %c0_12 = arith.constant 0 : index
    %c0_13 = arith.constant 0 : index
    %29 = vector.load %arg1[%c1, %c0_12, %c0_13] : memref<3x128x128xf32, #tpu.memory_space<vmem>>, vector<1x128x128xf32>
    %30 = vector.shape_cast %29 : vector<1x128x128xf32> to vector<128x128xf32>
    %cst_14 = arith.constant dense<0.000000e+00> : vector<8x128xf32>
    %31 = tpu.matmul %28, %30, %cst_14 {dimension_numbers = #tpu.dot_dimension_numbers<[1], [0], [0], [1], [0, 0, 1, 1], [], []>} : vector<8x128xf32>, vector<128x128xf32>, vector<8x128xf32> -> vector<8x128xf32>
    %32 = vector.extract_strided_slice %1 {offsets = [2, 0], sizes = [1, 128], strides = [1, 1]} : vector<8x128xf32> to vector<1x128xf32>
    %33 = vector.extract_strided_slice %1 {offsets = [3, 0], sizes = [1, 128], strides = [1, 1]} : vector<8x128xf32> to vector<1x128xf32>
    %cst_15 = arith.constant dense<0.000000e+00> : vector<128xf32>
    %34 = vector.multi_reduction <add>, %31, %cst_15 [0] : vector<8x128xf32> to vector<128xf32>
    %35 = vector.shape_cast %34 : vector<128xf32> to vector<1x128xf32>
    %cst_16 = arith.constant 8.000000e+00 : f32
    %36 = vector.broadcast %cst_16 : f32 to vector<1x128xf32>
    %37 = arith.divf %35, %36 : vector<1x128xf32>
    %38 = vector.broadcast %37 : vector<1x128xf32> to vector<8x128xf32>
    %39 = arith.subf %31, %38 : vector<8x128xf32>
    %40 = arith.mulf %39, %39 : vector<8x128xf32>
    %cst_17 = arith.constant dense<0.000000e+00> : vector<128xf32>
    %41 = vector.multi_reduction <add>, %40, %cst_17 [0] : vector<8x128xf32> to vector<128xf32>
    %42 = vector.shape_cast %41 : vector<128xf32> to vector<1x128xf32>
    %cst_18 = arith.constant 8.000000e+00 : f32
    %43 = vector.broadcast %cst_18 : f32 to vector<1x128xf32>
    %44 = arith.divf %42, %43 : vector<1x128xf32>
    %cst_19 = arith.constant 9.99999974E-6 : f32
    %45 = vector.broadcast %cst_19 : f32 to vector<1x128xf32>
    %46 = arith.addf %44, %45 : vector<1x128xf32>
    %47 = math.rsqrt %46 : vector<1x128xf32>
    %48 = arith.mulf %32, %47 : vector<1x128xf32>
    %49 = vector.broadcast %48 : vector<1x128xf32> to vector<8x128xf32>
    %50 = arith.mulf %39, %49 : vector<8x128xf32>
    %51 = vector.broadcast %33 : vector<1x128xf32> to vector<8x128xf32>
    %52 = arith.addf %50, %51 : vector<8x128xf32>
    %cst_20 = arith.constant 0.000000e+00 : f32
    %53 = vector.broadcast %cst_20 : f32 to vector<8x128xf32>
    %54 = arith.maximumf %52, %53 : vector<8x128xf32>
    %c2 = arith.constant 2 : index
    %c0_21 = arith.constant 0 : index
    %c0_22 = arith.constant 0 : index
    %55 = vector.load %arg1[%c2, %c0_21, %c0_22] : memref<3x128x128xf32, #tpu.memory_space<vmem>>, vector<1x128x128xf32>
    %56 = vector.shape_cast %55 : vector<1x128x128xf32> to vector<128x128xf32>
    %cst_23 = arith.constant dense<0.000000e+00> : vector<8x128xf32>
    %57 = tpu.matmul %54, %56, %cst_23 {dimension_numbers = #tpu.dot_dimension_numbers<[1], [0], [0], [1], [0, 0, 1, 1], [], []>} : vector<8x128xf32>, vector<128x128xf32>, vector<8x128xf32> -> vector<8x128xf32>
    %58 = vector.extract_strided_slice %1 {offsets = [4, 0], sizes = [1, 128], strides = [1, 1]} : vector<8x128xf32> to vector<1x128xf32>
    %59 = vector.broadcast %58 : vector<1x128xf32> to vector<8x128xf32>
    %60 = arith.addf %57, %59 : vector<8x128xf32>
    %c0_24 = arith.constant 0 : index
    %c0_25 = arith.constant 0 : index
    %61 = vector.load %arg3[%c0_24, %c0_25] : memref<8x128xf32, #tpu.memory_space<vmem>>, vector<8x128xf32>
    tpu.vector_store %arg3[%c0_24, %c0_25], %60 {strides = array<i32>} : memref<8x128xf32, #tpu.memory_space<vmem>>, vector<8x128xf32>,
    return
  }
}

</mosaic_0001>

<bundles_post_ra>
// kernel: tpu_custom_call.1
= control target key start
LH: loop header
LB: loop body
LE: loop exit
PB: predicated region body
PF: predicated region fallthrough
CT: control target
= control target key end

     0   :  { %8 = vsyncpa [#allocation3], 0  ;;  %s703_s0 = inlined_call_operand.hbm [shape: f32[8,32], index: 0, kind: input, shape index: {}]   ;;  %s704_s1 = inlined_call_operand.hbm [shape: f32[3,128,128], index: 1, kind: input, shape index: {}]   ;;  %s705_s2 = inlined_call_operand.hbm [shape: f32[8,128], index: 2, kind: input, shape index: {}]   ;;  %s706_s3 = inlined_call_operand.hbm [shape: f32[8,128], index: 3, kind: output, shape index: {}]  }
   0x1   :  { %9 = vsyncpa [#allocation6], 0 }
   0x2   :  { %10 = vsyncpa [#allocation4], 0  ;;  %s607_s12 = smov [#allocation5]  }
   0x3   :  { %s26_s13 = sshll.u32 %s607_s12, 4  ;;  %s27_s13 = int_to_ptr.vmem [resolvable:$true] %s26_s13 }
   0x4   :  { %s529_s14 = scalar_lea.vmem %s27_s13, 6144  ;;  %p534_p1 = scmp.lt.s32.totalorder %s27_s13, %s27_s13 }
   0x5   :  { %p530_p0 = scmp.ne.s32.totalorder %s27_s13, %s529_s14  ;;  %p535_p2 = scmp.lt.s32.totalorder %s529_s14, %s529_s14 }
   0x7   :  { %p536_p3 = por %p535_p2, %p534_p1 }
   0x9   :  { %p537_p4 = pnand %p536_p3, %p530_p0 }
   0xb   :  { %540 = shalt.err (!%p537_p4)
}
   0xc   :  { %s608_s15 = smov 128   ;;  %s609_s16 = smov 8  }
   0xd   :  { %32 = dma.hbm_to_vmem [thread:$0]  %s704_s1, 6144, %s27_s13, [#allocation6], %s608_s15, %s608_s15, %s609_s16  }
   0xe   :  { %s610_s19 = smov [#allocation2]   ;;  %s611_s21 = smov [#allocation7]  }
   0xf   :  { %s17_s20 = sshll.u32 %s610_s19, 4  ;;  %s39_s22 = sshll.u32 %s611_s21, 4  ;;  %s18_s20 = int_to_ptr.vmem [resolvable:$true] %s17_s20  ;;  %s40_s22 = int_to_ptr.vmem [resolvable:$true] %s39_s22 }
  0x10   :  { %s549_s23 = scalar_lea.vmem %s18_s20, 128  ;;  %p554_p6 = scmp.lt.s32.totalorder %s18_s20, %s18_s20 }
  0x11   :  { %p550_p5 = scmp.ne.s32.totalorder %s18_s20, %s549_s23  ;;  %p555_p7 = scmp.lt.s32.totalorder %s549_s23, %s549_s23 }
  0x13   :  { %p556_p8 = por %p555_p7, %p554_p6 }
  0x15   :  { %p557_p9 = pnand %p556_p8, %p550_p5 }
  0x17   :  { %560 = shalt.err (!%p557_p9)
}
  0x18   :  { %20 = dma.hbm_to_vmem [thread:$0]  %s703_s0, 128, %s18_s20, [#allocation3]  }
  0x19   :  { %s569_s26 = scalar_lea.vmem %s40_s22, 128  ;;  %p574_p11 = scmp.lt.s32.totalorder %s40_s22, %s40_s22 }
  0x1a   :  { %p570_p10 = scmp.ne.s32.totalorder %s40_s22, %s569_s26  ;;  %p575_p12 = scmp.lt.s32.totalorder %s569_s26, %s569_s26 }
  0x1c   :  { %p576_p13 = por %p575_p12, %p574_p11 }
  0x1e   :  { %p577_p0 = pnand %p576_p13, %p570_p10 }
  0x20   :  { %580 = shalt.err (!%p577_p0)
}
  0x21   :  { %42 = dma.hbm_to_vmem [thread:$0]  %s705_s2, 128, %s40_s22, [#allocation6]  }
  0x22   :  { %601 = dma.done.wait [#allocation3], 128  }
  0x23   :  { %602 = vsyncadd [#allocation3], 4294967168 }
  0x24   :  { %603 = dma.done.wait [#allocation6], 6272  }
  0x25   :  { %604 = vsyncadd [#allocation6], 4294961024  ;;  %v612_v0 = vmov 0.0   ;;  %vm613_vm0 = vmmov 0   ;;  %v57_v1 = vld [vmem:[#allocation5 + $0x18] sm:$0xff]  ;;  %v56_v2 = vld [vmem:[#allocation5 + $0x10] sm:$0xff]  ;;  %v152_v41 = vlaneseq }
  0x26   :  { %428 = vmatprep.subr.mxu0 %v612_v0  ;;  %436 = vmatprep.mubr.msk.f32.mxu0 %vm613_vm0, %v612_v0  ;;  %v55_v3 = vld [vmem:[#allocation5 + $0x8] sm:$0xff]  ;;  %v54_v4 = vld [vmem:[#allocation5] sm:$0xff]  ;;  %v52_v5 = vld [vmem:[#allocation2] sm:$0xff]  ;;  %vm58_vm1 = vcmask 261120   ;;  %s614_s0 = smov [#allocation8]  }
  0x27   :  { %439 = vmatprep.subr.mxu1 %v612_v0  ;;  %471 = vmatprep.mubr.msk.f32.mxu1 %vm613_vm0, %v612_v0  ;;  %v179_v6 = vld [vmem:[#allocation5 + $0xf8] sm:$0xff]  ;;  %v178_v7 = vld [vmem:[#allocation5 + $0xf0] sm:$0xff]  ;;  %v177_v8 = vld [vmem:[#allocation5 + $0xe8] sm:$0xff]  ;;  %v671_v42 = vshrl.u32 %v152_v41, 7  ;;  %s378_s2 = sshll.u32 %s614_s0, 4  ;;  %s379_s2 = int_to_ptr.vmem [resolvable:$true] %s378_s2 }
  0x28   :  { %429 = vmatpush3.msra.mxu0 %v57_v1  ;;  %440 = vmatpush3.msra.mxu1 %v179_v6  ;;  %v176_v9 = vld [vmem:[#allocation5 + $0xe0] sm:$0xff]  ;;  %v175_v10 = vld [vmem:[#allocation5 + $0xd8] sm:$0xff]  ;;  %v174_v11 = vld [vmem:[#allocation5 + $0xd0] sm:$0xff]  ;;  %s581_s28 = scalar_lea.vmem %s379_s2, 128  ;;  %p586_p2 = scmp.lt.s32.totalorder %s379_s2, %s379_s2 }
  0x29   :  { %430 = vmatprep.subr.mxu0 %v612_v0  ;;  %441 = vmatprep.subr.mxu1 %v612_v0  ;;  %v173_v12 = vld [vmem:[#allocation5 + $0xc8] sm:$0xff]  ;;  %v172_v13 = vld [vmem:[#allocation5 + $0xc0] sm:$0xff]  ;;  %v171_v14 = vld [vmem:[#allocation5 + $0xb8] sm:$0xff]  ;;  %v154_v44 = vsub.s32 0, %v671_v42  ;;  %v159_v45 = vsub.s32 1, %v671_v42  ;;  %p582_p1 = scmp.ne.s32.totalorder %s379_s2, %s581_s28  ;;  %p587_p3 = scmp.lt.s32.totalorder %s581_s28, %s581_s28 }
  0x2a   :  { %431 = vmatpush3.msra.mxu0 %v56_v2  ;;  %442 = vmatpush3.msra.mxu1 %v178_v7  ;;  %v170_v15 = vld [vmem:[#allocation5 + $0xb0] sm:$0xff]  ;;  %v169_v16 = vld [vmem:[#allocation5 + $0xa8] sm:$0xff]  ;;  %v168_v17 = vld [vmem:[#allocation5 + $0xa0] sm:$0xff] }
  0x2b   :  { %432 = vmatprep.subr.mxu0 %v612_v0  ;;  %443 = vmatprep.subr.mxu1 %v612_v0  ;;  %v167_v18 = vld [vmem:[#allocation5 + $0x98] sm:$0xff]  ;;  %v166_v19 = vld [vmem:[#allocation5 + $0x90] sm:$0xff]  ;;  %v165_v20 = vld [vmem:[#allocation5 + $0x88] sm:$0xff]  ;;  %p588_p4 = por %p587_p3, %p586_p2 }
  0x2c   :  { %433 = vmatpush3.msra.mxu0 %v55_v3  ;;  %444 = vmatpush3.msra.mxu1 %v177_v8  ;;  %v164_v21 = vld [vmem:[#allocation5 + $0x80] sm:$0xff]  ;;  %v296_v53 = vld [vmem:[#allocation5 + $0x178] sm:$0xff]  ;;  %v295_v54 = vld [vmem:[#allocation5 + $0x170] sm:$0xff] }
  0x2d   :  { %434 = vmatprep.subr.mxu0 %v612_v0  ;;  %445 = vmatprep.subr.mxu1 %v612_v0  ;;  %v673_v43 = vld [vmem:[#allocation7] sm:$0xff]  ;;  %v294_v55 = vld [vmem:[#allocation5 + $0x168] sm:$0xff]  ;;  %v292_v57 = vld [vmem:[#allocation5 + $0x158] sm:$0xff]  ;;  %p589_p5 = pnand %p588_p4, %p582_p1 }
  0x2e   :  { %435 = vmatpush3.msra.mxu0 %v54_v4  ;;  %446 = vmatpush3.msra.mxu1 %v176_v9  ;;  %v160_v49 = vrot.slane %v673_v43, %v159_v45  ;;  %v293_v56 = vld [vmem:[#allocation5 + $0x160] sm:$0xff]  ;;  %v291_v58 = vld [vmem:[#allocation5 + $0x150] sm:$0xff]  ;;  %v290_v59 = vld [vmem:[#allocation5 + $0x148] sm:$0xff] }
  0x2f   :  { %437 = vmatmul.mubr.msk.f32.vlgmr.msra.gmra.mxu0 %vm58_vm1, %v52_v5  ;;  %474 = vmatprep.subr.mxu0 %v612_v0  ;;  %v289_v60 = vld [vmem:[#allocation5 + $0x140] sm:$0xff]  ;;  %v288_v61 = vld [vmem:[#allocation5 + $0x138] sm:$0xff]  ;;  %v287_v62 = vld [vmem:[#allocation5 + $0x130] sm:$0xff] }
  0x30   :  { %506 = vmatprep.mubr.msk.f32.mxu0 %vm613_vm0, %v612_v0  ;;  %447 = vmatprep.subr.mxu1 %v612_v0  ;;  %v286_v63 = vld [vmem:[#allocation5 + $0x128] sm:$0xff]  ;;  %v285_v1 = vld [vmem:[#allocation5 + $0x120] sm:$0xff]  ;;  %v284_v2 = vld [vmem:[#allocation5 + $0x118] sm:$0xff] }
  0x31   :  { %448 = vmatpush3.msra.mxu1 %v175_v10  ;;  %475 = vmatpush3.msra.mxu0 %v296_v53  ;;  %v283_v3 = vld [vmem:[#allocation5 + $0x110] sm:$0xff]  ;;  %v282_v4 = vld [vmem:[#allocation5 + $0x108] sm:$0xff]  ;;  %v281_v5 = vld [vmem:[#allocation5 + $0x100] sm:$0xff] }
  0x32   :  { %449 = vmatprep.subr.mxu1 %v612_v0  ;;  %476 = vmatprep.subr.mxu0 %v612_v0 }
  0x33   :  { %450 = vmatpush3.msra.mxu1 %v174_v11  ;;  %477 = vmatpush3.msra.mxu0 %v295_v54 }
  0x34   :  { %451 = vmatprep.subr.mxu1 %v612_v0  ;;  %478 = vmatprep.subr.mxu0 %v612_v0 }
  0x35   :  { %452 = vmatpush3.msra.mxu1 %v173_v12  ;;  %479 = vmatpush3.msra.mxu0 %v294_v55 }
  0x36   :  { %453 = vmatprep.subr.mxu1 %v612_v0  ;;  %480 = vmatprep.subr.mxu0 %v612_v0 }
  0x37   :  { %454 = vmatpush3.msra.mxu1 %v172_v13  ;;  %481 = vmatpush3.msra.mxu0 %v293_v56 }
  0x38   :  { %455 = vmatprep.subr.mxu1 %v612_v0  ;;  %482 = vmatprep.subr.mxu0 %v612_v0 }
  0x39   :  { %456 = vmatpush3.msra.mxu1 %v171_v14  ;;  %483 = vmatpush3.msra.mxu0 %v292_v57 }
  0x3a   :  { %457 = vmatprep.subr.mxu1 %v612_v0  ;;  %484 = vmatprep.subr.mxu0 %v612_v0 }
  0x3b   :  { %458 = vmatpush3.msra.mxu1 %v170_v15  ;;  %485 = vmatpush3.msra.mxu0 %v291_v58 }
  0x3c   :  { %459 = vmatprep.subr.mxu1 %v612_v0  ;;  %486 = vmatprep.subr.mxu0 %v612_v0 }
  0x3d   :  { %460 = vmatpush3.msra.mxu1 %v169_v16  ;;  %487 = vmatpush3.msra.mxu0 %v290_v59 }
  0x3e   :  { %461 = vmatprep.subr.mxu1 %v612_v0  ;;  %488 = vmatprep.subr.mxu0 %v612_v0 }
  0x3f   :  { %462 = vmatpush3.msra.mxu1 %v168_v17  ;;  %489 = vmatpush3.msra.mxu0 %v289_v60 }
  0x40   :  { %463 = vmatprep.subr.mxu1 %v612_v0  ;;  %490 = vmatprep.subr.mxu0 %v612_v0 }
  0x41   :  { %464 = vmatpush3.msra.mxu1 %v167_v18  ;;  %491 = vmatpush3.msra.mxu0 %v288_v61 }
  0x42   :  { %465 = vmatprep.subr.mxu1 %v612_v0  ;;  %492 = vmatprep.subr.mxu0 %v612_v0 }
  0x43   :  { %466 = vmatpush3.msra.mxu1 %v166_v19  ;;  %493 = vmatpush3.msra.mxu0 %v287_v62 }
  0x44   :  { %467 = vmatprep.subr.mxu1 %v612_v0  ;;  %494 = vmatprep.subr.mxu0 %v612_v0 }
  0x45   :  { %468 = vmatpush3.msra.mxu1 %v165_v20  ;;  %495 = vmatpush3.msra.mxu0 %v286_v63 }
  0x46   :  { %469 = vmatprep.subr.mxu1 %v612_v0  ;;  %496 = vmatprep.subr.mxu0 %v612_v0 }
  0x47   :  { %470 = vmatpush3.msra.mxu1 %v164_v21  ;;  %497 = vmatpush3.msra.mxu0 %v285_v1 }
  0x48   :  { %498 = vmatprep.subr.mxu0 %v612_v0 }
  0x49   :  { %499 = vmatpush3.msra.mxu0 %v284_v2 }
  0x4a   :  { %500 = vmatprep.subr.mxu0 %v612_v0 }
  0x4b   :  { %501 = vmatpush3.msra.mxu0 %v283_v3 }
  0x4c   :  { %502 = vmatprep.subr.mxu0 %v612_v0 }
  0x4d   :  { %503 = vmatpush3.msra.mxu0 %v282_v4 }
  0x4e   :  { %504 = vmatprep.subr.mxu0 %v612_v0 }
  0x4f   :  { %505 = vmatpush3.msra.mxu0 %v281_v5 }
  0xef   :  { %v128_v22 = vpop.f32.mrf.mxu0 }
  0xf0   :  { %v132_v23 = vrot.slane %v128_v22, 4 }
  0xf1   :  { %v438_v24 = vpop.f32.mrf.mxu0 }
  0xf2   :  { %v133_v25 = vadd.f32 %v132_v23, %v128_v22  ;;  %v271_v24 = vsub.s32 2, %v671_v42 }
  0xf4   :  { %v134_v26 = vrot.slane %v133_v25, 2 }
  0xf6   :  { %v135_v27 = vadd.f32 %v134_v26, %v133_v25  ;;  %v276_v25 = vsub.s32 3, %v671_v42 }
  0xf8   :  { %v136_v28 = vrot.slane %v135_v27, 1 }
  0xfa   :  { %v137_v29 = vadd.f32 %v136_v28, %v135_v27 }
  0xfc   :  { %v139_v30 = vmul.f32 0.125, %v137_v29  ;;  %v277_v29 = vrot.slane %v673_v43, %v276_v25 }
  0xfe   :  { %v140_v31 = vsub.f32 %v128_v22, %v139_v30 }
 0x100   :  { %v141_v32 = vmul.f32 %v140_v31, %v140_v31 }
 0x102   :  { %v142_v33 = vrot.slane %v141_v32, 4 }
 0x104   :  { %v143_v34 = vadd.f32 %v142_v33, %v141_v32  ;;  %v299_v33 = vsub.s32 4, %v671_v42 }
 0x106   :  { %v144_v35 = vrot.slane %v143_v34, 2 }
 0x108   :  { %v145_v36 = vadd.f32 %v144_v35, %v143_v34  ;;  %v300_v34 = vrot.slane %v673_v43, %v299_v33 }
 0x10a   :  { %v146_v37 = vrot.slane %v145_v36, 1 }
 0x10c   :  { %v147_v38 = vadd.f32 %v146_v37, %v145_v36 }
 0x10e   :  { %v148_v39 = vmul.f32 0.125, %v147_v38 }
 0x110   :  { %v149_v40 = vadd.f32 1e-05, %v148_v39 }
 0x112   :  { %517 = vrsqrt.f32 %v149_v40 }
 0x11f   :  { %v518_v46 = vpop.eup %517 }
 0x120   :  { %v151_v47 = vmul.f32 %v518_v46, %v673_v43 }
 0x122   :  { %v155_v48 = vrot.slane %v151_v47, %v154_v44 }
 0x124   :  { %v156_v50 = vmul.f32 %v155_v48, %v140_v31 }
 0x126   :  { %v161_v51 = vadd.f32 %v160_v49, %v156_v50 }
 0x128   :  { %v162_v52 = vmax.f32 %v161_v51, 0.0 }
 0x12a   :  { %472 = vmatmul.mubr.f32.vlgmr.msra.gmra.mxu1 %v162_v52 }
 0x1ea   :  { %v246_v6 = vpop.f32.mrf.mxu1 }
 0x1eb   :  { %v250_v7 = vrot.slane %v246_v6, 4 }
 0x1ec   :  { %v473_v8 = vpop.f32.mrf.mxu1 }
 0x1ed   :  { %v251_v9 = vadd.f32 %v250_v7, %v246_v6 }
 0x1ef   :  { %v252_v10 = vrot.slane %v251_v9, 2 }
 0x1f1   :  { %v253_v11 = vadd.f32 %v252_v10, %v251_v9 }
 0x1f3   :  { %v254_v12 = vrot.slane %v253_v11, 1 }
 0x1f5   :  { %v255_v13 = vadd.f32 %v254_v12, %v253_v11 }
 0x1f7   :  { %v256_v14 = vmul.f32 0.125, %v255_v13 }
 0x1f9   :  { %v257_v15 = vsub.f32 %v246_v6, %v256_v14 }
 0x1fb   :  { %v258_v16 = vmul.f32 %v257_v15, %v257_v15 }
 0x1fd   :  { %v259_v17 = vrot.slane %v258_v16, 4 }
 0x1ff   :  { %v260_v18 = vadd.f32 %v259_v17, %v258_v16 }
 0x201   :  { %v261_v19 = vrot.slane %v260_v18, 2 }
 0x203   :  { %v262_v20 = vadd.f32 %v261_v19, %v260_v18 }
 0x205   :  { %v263_v21 = vrot.slane %v262_v20, 1 }
 0x207   :  { %v264_v22 = vadd.f32 %v263_v21, %v262_v20 }
 0x209   :  { %v265_v23 = vmul.f32 0.125, %v264_v22 }
 0x20b   :  { %v266_v0 = vadd.f32 1e-05, %v265_v23 }
 0x20d   :  { %519 = vrsqrt.f32 %v266_v0 }
 0x21a   :  { %v520_v26 = vpop.eup %519 }
 0x21b   :  { %v268_v27 = vmul.f32 %v520_v26, %v673_v43 }
 0x21d   :  { %v272_v28 = vrot.slane %v268_v27, %v271_v24 }
 0x21f   :  { %v273_v30 = vmul.f32 %v272_v28, %v257_v15 }
 0x221   :  { %v278_v31 = vadd.f32 %v277_v29, %v273_v30 }
 0x223   :  { %v279_v32 = vmax.f32 %v278_v31, 0.0 }
 0x225   :  { %507 = vmatmul.mubr.f32.vlgmr.msra.gmra.mxu0 %v279_v32 }
 0x2e5   :  { %v367_v35 = vpop.f32.mrf.mxu0 }
 0x2e6   :  { %v368_v36 = vadd.f32 %v367_v35, %v300_v34 }
 0x2e7   :  { %v508_v37 = vpop.f32.mrf.mxu0 }
 0x2e8   :  { %371 = vst [vmem:[#allocation8] sm:$0xff] %v368_v36 }
 0x2e9   :  { %592 = shalt.err (!%p589_p5)
}
 0x2ea   :  { %381 = dma.vmem_to_hbm [thread:$0]  %s379_s2, 128, %s706_s3, [#allocation4]  }
 0x2eb   :  { %605 = dma.done.wait [#allocation4], 128  }
 0x2ec   :  { %606 = vsyncadd [#allocation4], 4294967168 }
 0x2ed   :  { %385 = vsyncpa [#allocation3], 1 }
 0x2ee   :  { %386 = vsyncpa [#allocation6], 1 }
 0x2ef   :  { %387 = vsyncpa [#allocation4], 1 }

</bundles_post_ra>
